<compile_context>
chip_gen: v5e
topology: v5e:2x2
jax: 0.10.0
libtpu: 0.0.40
codegen_flags: <defaults>
</compile_context>

<pallas_src>
import functools

import jax
import jax.numpy as jnp
from jax.experimental import pallas as pl
from jax.experimental.pallas import tpu as pltpu

LANES = 1024       # lane-dense slab width (multiple of 128 -> unmasked vld/vst)
SUBLANES = 8
N_CORES = 2        # chunk axis size; becomes a real 2-TC split on v7x


def _cdiv(a, b):
    return -(-a // b)


def _device_config():
    """Per-generation block size / VMEM budget / core-split capability."""
    try:
        kind = jax.devices()[0].device_kind.lower()
    except Exception:
        kind = ""
    if "v7" in kind:
        # 64 MiB physical VMEM -> leave headroom; 2 TensorCores per chip.
        return dict(block_rows=1024, vmem_limit=48 * 1024 * 1024, two_cores=True)
    if "v5 lite" in kind or "v5e" in kind or "v5lite" in kind:
        # HBM-bound at ~0.8 TB/s; bigger blocks buy little, but set the VMEM
        # limit explicitly (scoped default is only 16 MiB of 128 MiB physical).
        return dict(block_rows=512, vmem_limit=64 * 1024 * 1024, two_cores=False)
    # v6e / v5p / v4 / unknown: 128 MiB physical VMEM, plenty of headroom.
    return dict(block_rows=1024, vmem_limit=64 * 1024 * 1024, two_cores=False)


def _focal_kernel(x_ref, t_ref, o_ref, *, alpha, gamma, int_gamma,
                  steps_per_chunk, valid_rows, needs_mask):
    c = pl.program_id(0)
    s = pl.program_id(1)

    @pl.when(s == 0)
    def _():
        o_ref[...] = jnp.zeros_like(o_ref)

    x = x_ref[...].astype(jnp.float32)
    t = t_ref[...].astype(jnp.float32)

    # One EUP exp shared by BCE and sigmoid; approx vrcp for the denominator.
    e = jnp.exp(-jnp.abs(x))
    ce = jnp.maximum(x, 0.0) - x * t + jnp.log1p(e)            # stable BCE-with-logits
    probs = jnp.where(x >= 0.0, 1.0, e) * pl.reciprocal(1.0 + e, approx=True)

    # u = 1 - pt, with pt = p*t + (1-p)*(1-t) algebraically fused.
    u = probs + t - 2.0 * probs * t

    if int_gamma is not None:             # strength-reduce pow for integer gamma
        if int_gamma == 0:
            fw = jnp.ones_like(u)
        else:
            fw = u
            for _ in range(int_gamma - 1):
                fw = fw * u
    else:
        fw = u ** jnp.float32(gamma)

    if alpha == 1.0:
        aw = t
    else:
        aw = (1.0 - alpha) + (2.0 * alpha - 1.0) * t
    focal = aw * fw * ce

    br, lanes = focal.shape
    if needs_mask:
        # Zero contributions from rows past the true row count (ragged last
        # block and/or the clamped duplicate trailing block).  Any garbage in
        # the padded region is dropped by the select (select does not propagate
        # NaN/Inf from the unselected branch).
        row0 = (c * steps_per_chunk + s) * br
        row_ids = jax.lax.broadcasted_iota(jnp.int32, (br, 1), 0) + row0
        focal = jnp.where(row_ids < valid_rows, focal, 0.0)

    # Pure-VPU partial reduce into the vreg-shaped accumulator; the reshape only
    # splits the sublane-block axis (lanes untouched), so it is layout-preserving.
    partial = jnp.sum(focal.reshape(br // SUBLANES, SUBLANES, lanes), axis=0)
    o_ref[...] += partial


def _focal_elems(x, t, alpha, gamma):
    """Plain-JAX elementwise focal loss (used only for the tiny ragged tail)."""
    x = x.astype(jnp.float32)
    t = t.astype(jnp.float32)
    e = jnp.exp(-jnp.abs(x))
    ce = jnp.maximum(x, 0.0) - x * t + jnp.log1p(e)
    probs = jnp.where(x >= 0.0, 1.0, e) / (1.0 + e)
    u = probs + t - 2.0 * probs * t
    fw = u ** jnp.float32(gamma)
    aw = alpha * t + (1.0 - alpha) * (1.0 - t)
    return aw * fw * ce


def focal_loss(inputs, targets, alpha=1.0, gamma=2.0, reduction="mean",
               block_rows_override=None):
    """Focal loss over logits/targets of identical shape. Returns a scalar."""
    assert inputs.shape == targets.shape
    assert float(gamma) >= 0.0
    total = int(inputs.size)
    assert total > 0
    if reduction not in ("mean", "sum"):
        # TODO(synk): reduction='none' (full-shape elementwise output) is not
        # implemented in-kernel; only 'mean'/'sum' are supported.
        raise NotImplementedError("reduction='none' not implemented")

    x_flat = inputs.reshape(-1)           # free bitcast reshape of the full array
    t_flat = targets.reshape(-1)

    rows = total // LANES                 # full lane-dense rows
    tail = total - rows * LANES           # < LANES leftover elements

    g = float(gamma)
    int_gamma = int(g) if (g.is_integer() and 0.0 <= g <= 8.0) else None
    a = float(alpha)

    loss_sum = jnp.zeros((), jnp.float32)

    if rows > 0:
        cfg = _device_config()
        block_rows = cfg["block_rows"] if block_rows_override is None else block_rows_override
        block_rows = min(block_rows, max(SUBLANES, _cdiv(rows, SUBLANES) * SUBLANES))

        n_steps = _cdiv(rows, block_rows)
        n_chunks = N_CORES if n_steps >= N_CORES else 1
        steps_per_chunk = _cdiv(n_steps, n_chunks)
        total_steps = n_chunks * steps_per_chunk
        needs_mask = total_steps * block_rows > rows

        # Largest LANES-aligned prefix; when tail == 0 this is the whole array
        # and the slice+reshape is free.
        head = rows * LANES
        x2d = x_flat[:head].reshape(rows, LANES)
        t2d = t_flat[:head].reshape(rows, LANES)

        if total_steps > n_steps:
            # Extra trailing step(s) from rounding steps up to chunks: clamp the
            # block index so the DMA stays in-bounds; the in-kernel row mask
            # zeroes the duplicate contribution.
            row_map = lambda c, s: (jnp.minimum(c * steps_per_chunk + s, n_steps - 1), 0)
        else:
            row_map = lambda c, s: (c * steps_per_chunk + s, 0)

        kernel = functools.partial(
            _focal_kernel, alpha=a, gamma=g, int_gamma=int_gamma,
            steps_per_chunk=steps_per_chunk, valid_rows=rows,
            needs_mask=needs_mask)

        chunk_sem = (pltpu.CORE_PARALLEL
                     if (cfg["two_cores"] and n_chunks == N_CORES) else "parallel")

        cost = pl.CostEstimate(
            flops=20 * head,
            transcendentals=3 * head,
            bytes_accessed=head * (x2d.dtype.itemsize + t2d.dtype.itemsize)
            + n_chunks * SUBLANES * LANES * 4,
        )

        partial_sums = pl.pallas_call(
            kernel,
            out_shape=jax.ShapeDtypeStruct((n_chunks, SUBLANES, LANES), jnp.float32),
            grid_spec=pltpu.PrefetchScalarGridSpec(
                num_scalar_prefetch=0,
                grid=(n_chunks, steps_per_chunk),
                in_specs=[
                    pl.BlockSpec((block_rows, LANES), row_map),
                    pl.BlockSpec((block_rows, LANES), row_map),
                ],
                out_specs=pl.BlockSpec((None, SUBLANES, LANES), lambda c, s: (c, 0, 0)),
            ),
            compiler_params=pltpu.CompilerParams(
                dimension_semantics=(chunk_sem, "arbitrary"),
                vmem_limit_bytes=cfg["vmem_limit"],
            ),
            cost_estimate=cost,
        )(x2d, t2d)

        loss_sum = loss_sum + jnp.sum(partial_sums)

    if tail > 0:
        # Sub-1024-element ragged tail: negligible cost, computed in plain JAX.
        loss_sum = loss_sum + jnp.sum(
            _focal_elems(x_flat[rows * LANES:], t_flat[rows * LANES:], a, g))

    if reduction == "mean":
        return loss_sum / jnp.float32(total)
    return loss_sum


def focal_loss_ref(inputs, targets, alpha=1.0, gamma=2.0):
    x = inputs.astype(jnp.float32)
    t = targets.astype(jnp.float32)
    probs = jax.nn.sigmoid(x)
    ce = jnp.maximum(x, 0.0) - x * t + jnp.log1p(jnp.exp(-jnp.abs(x)))
    pt = probs * t + (1.0 - probs) * (1.0 - t)
    fw = (1.0 - pt) ** gamma
    aw = alpha * t + (1.0 - alpha) * (1.0 - t)
    return jnp.mean(aw * fw * ce)


if __name__ == "__main__":
    key = jax.random.PRNGKey(0)
    k1, k2, k3, k4, k5, k6 = jax.random.split(key, 6)

    # Tolerances are set to absorb the approx-reciprocal sigmoid denominator
    # (few-1e-4 relative) plus bf16 input rounding in test 2.
    RTOL, ATOL = 5e-3, 1e-6

    # Test 1: f32 NCHW logits/targets (shapes the module implies); alpha=0.25
    # exercises the negative-class alpha branch and the masked partial block
    # (2 valid rows inside an 8-row block).
    B, C, H, W = 2, 4, 16, 16
    logits = jax.random.normal(k1, (B, C, H, W), dtype=jnp.float32) * 2.0
    targets = (jax.random.uniform(k2, (B, C, H, W)) > 0.7).astype(jnp.float32)
    loss = jax.block_until_ready(focal_loss(logits, targets, alpha=0.25, gamma=2.0))
    ref = focal_loss_ref(logits, targets, alpha=0.25, gamma=2.0)
    assert jnp.allclose(loss, ref, rtol=RTOL, atol=ATOL), (loss, ref)

    # Test 2: bf16 inputs with an odd element count -> kernel prefix (1 row)
    # plus the plain-JAX ragged tail.
    B2, C2, H2, W2 = 2, 3, 17, 19
    logits2 = (jax.random.normal(k3, (B2, C2, H2, W2)) * 2.0).astype(jnp.bfloat16)
    targets2 = (jax.random.uniform(k4, (B2, C2, H2, W2)) > 0.5).astype(jnp.bfloat16)
    loss2 = jax.block_until_ready(focal_loss(logits2, targets2, alpha=1.0, gamma=2.0))
    ref2 = focal_loss_ref(logits2, targets2, alpha=1.0, gamma=2.0)
    assert jnp.allclose(loss2, ref2, rtol=RTOL, atol=ATOL), (loss2, ref2)

    # Test 3: multi-step accumulation + 2-chunk axis + clamped duplicate step
    # (rows=24, block_rows=8 -> 3 real steps rounded up to 2x2) and gamma=3.
    B3, C3, H3, W3 = 2, 4, 48, 64
    logits3 = jax.random.normal(k5, (B3, C3, H3, W3), dtype=jnp.float32) * 2.0
    targets3 = (jax.random.uniform(k6, (B3, C3, H3, W3)) > 0.6).astype(jnp.float32)
    loss3 = jax.block_until_ready(
        focal_loss(logits3, targets3, alpha=0.5, gamma=3.0, block_rows_override=8))
    ref3 = focal_loss_ref(logits3, targets3, alpha=0.5, gamma=3.0)
    assert jnp.allclose(loss3, ref3, rtol=RTOL, atol=ATOL), (loss3, ref3)

    print("KERNEL_OK")
</pallas_src>

<mosaic_0001>
module attributes {stable_mosaic.version = 11 : i64} {
  func.func @_focal_kernel(%arg0: i32, %arg1: i32, %arg2: memref<8x1024xf32, #tpu.memory_space<vmem>>, %arg3: memref<8x1024xf32, #tpu.memory_space<vmem>>, %arg4: memref<1x8x1024xf32, #tpu.memory_space<vmem>>) attributes {dimension_semantics = [#tpu.dimension_semantics<parallel>, #tpu.dimension_semantics<arbitrary>], iteration_bounds = array<i64: 1, 1>, scalar_prefetch = 0 : i64, scratch_operands = 0 : i64, tpu.core_type = #tpu.core_type<tc>, window_params = [{transform_indices = @transform_0, window_bounds = array<i64: 8, 1024>}, {transform_indices = @transform_1, window_bounds = array<i64: 8, 1024>}, {transform_indices = @transform_2, window_bounds = array<i64: 1, 8, 1024>}]} {
    %c0_i32 = arith.constant 0 : i32
    %0 = arith.cmpi eq, %arg1, %c0_i32 : i32
    %1 = arith.extui %0 : i1 to i32
    %c0_i32_0 = arith.constant 0 : i32
    %2 = arith.cmpi ne, %1, %c0_i32_0 : i32
    scf.if %2 {
      %cst_19 = arith.constant 0.000000e+00 : f32
      %55 = vector.broadcast %cst_19 : f32 to vector<8x1024xf32>
      %c0_20 = arith.constant 0 : index
      %c0_21 = arith.constant 0 : index
      %c0_22 = arith.constant 0 : index
      %56 = vector.load %arg4[%c0_20, %c0_21, %c0_22] : memref<1x8x1024xf32, #tpu.memory_space<vmem>>, vector<1x8x1024xf32>
      %57 = vector.shape_cast %56 : vector<1x8x1024xf32> to vector<8x1024xf32>
      %58 = vector.shape_cast %55 : vector<8x1024xf32> to vector<1x8x1024xf32>
      tpu.vector_store %arg4[%c0_20, %c0_21, %c0_22], %58 {strides = array<i32>} : memref<1x8x1024xf32, #tpu.memory_space<vmem>>, vector<1x8x1024xf32>,
    } else {
    }
    %c0 = arith.constant 0 : index
    %c0_1 = arith.constant 0 : index
    %3 = vector.load %arg2[%c0, %c0_1] : memref<8x1024xf32, #tpu.memory_space<vmem>>, vector<8x1024xf32>
    %c0_2 = arith.constant 0 : index
    %c0_3 = arith.constant 0 : index
    %4 = vector.load %arg3[%c0_2, %c0_3] : memref<8x1024xf32, #tpu.memory_space<vmem>>, vector<8x1024xf32>
    %5 = math.absf %3 : vector<8x1024xf32>
    %cst = arith.constant 0.000000e+00 : f32
    %6 = vector.broadcast %cst : f32 to vector<8x1024xf32>
    %7 = arith.subf %6, %5 : vector<8x1024xf32>
    %8 = math.exp %7 : vector<8x1024xf32>
    %cst_4 = arith.constant 0.000000e+00 : f32
    %9 = vector.broadcast %cst_4 : f32 to vector<8x1024xf32>
    %10 = arith.maximumf %3, %9 : vector<8x1024xf32>
    %11 = arith.mulf %3, %4 : vector<8x1024xf32>
    %12 = arith.subf %10, %11 : vector<8x1024xf32>
    %13 = math.log1p %8 : vector<8x1024xf32>
    %14 = arith.addf %12, %13 : vector<8x1024xf32>
    %cst_5 = arith.constant 0.000000e+00 : f32
    %15 = vector.broadcast %cst_5 : f32 to vector<8x1024xf32>
    %16 = arith.cmpf oge, %3, %15 : vector<8x1024xf32>
    %cst_6 = arith.constant 1.000000e+00 : f32
    %17 = vector.broadcast %cst_6 : f32 to vector<8x1024xf32>
    %18 = arith.select %16, %17, %8 : vector<8x1024xi1>, vector<8x1024xf32>
    %cst_7 = arith.constant 1.000000e+00 : f32
    %19 = vector.broadcast %cst_7 : f32 to vector<8x1024xf32>
    %20 = arith.addf %19, %8 : vector<8x1024xf32>
    %21 = tpu.reciprocal %20 {approx = true} : vector<8x1024xf32> -> vector<8x1024xf32>
    %22 = arith.mulf %18, %21 : vector<8x1024xf32>
    %23 = arith.addf %22, %4 : vector<8x1024xf32>
    %cst_8 = arith.constant 2.000000e+00 : f32
    %24 = vector.broadcast %cst_8 : f32 to vector<8x1024xf32>
    %25 = arith.mulf %24, %22 : vector<8x1024xf32>
    %26 = arith.mulf %25, %4 : vector<8x1024xf32>
    %27 = arith.subf %23, %26 : vector<8x1024xf32>
    %28 = arith.mulf %27, %27 : vector<8x1024xf32>
    %cst_9 = arith.constant -5.000000e-01 : f32
    %29 = vector.broadcast %cst_9 : f32 to vector<8x1024xf32>
    %30 = arith.mulf %29, %4 : vector<8x1024xf32>
    %cst_10 = arith.constant 7.500000e-01 : f32
    %31 = vector.broadcast %cst_10 : f32 to vector<8x1024xf32>
    %32 = arith.addf %31, %30 : vector<8x1024xf32>
    %33 = arith.mulf %32, %28 : vector<8x1024xf32>
    %34 = arith.mulf %33, %14 : vector<8x1024xf32>
    %c1_i32 = arith.constant 1 : i32
    %35 = arith.muli %arg0, %c1_i32 : i32
    %36 = arith.addi %35, %arg1 : i32
    %c8_i32 = arith.constant 8 : i32
    %37 = arith.muli %36, %c8_i32 : i32
    %38 = tpu.iota {dimensions = array<i32: 0>} : vector<8x1xi32>
    %39 = vector.broadcast %37 : i32 to vector<8x1xi32>
    %40 = arith.addi %38, %39 : vector<8x1xi32>
    %c2_i32 = arith.constant 2 : i32
    %41 = vector.broadcast %c2_i32 : i32 to vector<8x1xi32>
    %42 = arith.cmpi slt, %40, %41 : vector<8x1xi32>
    %cst_11 = arith.constant 0.000000e+00 : f32
    %43 = vector.shape_cast %42 : vector<8x1xi1> to vector<8x1xi1>
    %44 = vector.broadcast %43 : vector<8x1xi1> to vector<8x1024xi1>
    %45 = vector.broadcast %cst_11 : f32 to vector<8x1024xf32>
    %46 = arith.select %44, %34, %45 : vector<8x1024xi1>, vector<8x1024xf32>
    %47 = vector.shape_cast %46 : vector<8x1024xf32> to vector<1x8x1024xf32>
    %cst_12 = arith.constant dense<0.000000e+00> : vector<8x1024xf32>
    %48 = vector.multi_reduction <add>, %47, %cst_12 [0] : vector<1x8x1024xf32> to vector<8x1024xf32>
    %c0_13 = arith.constant 0 : index
    %c0_14 = arith.constant 0 : index
    %c0_15 = arith.constant 0 : index
    %49 = vector.load %arg4[%c0_13, %c0_14, %c0_15] : memref<1x8x1024xf32, #tpu.memory_space<vmem>>, vector<1x8x1024xf32>
    %50 = vector.shape_cast %49 : vector<1x8x1024xf32> to vector<8x1024xf32>
    %51 = arith.addf %50, %48 : vector<8x1024xf32>
    %c0_16 = arith.constant 0 : index
    %c0_17 = arith.constant 0 : index
    %c0_18 = arith.constant 0 : index
    %52 = vector.load %arg4[%c0_16, %c0_17, %c0_18] : memref<1x8x1024xf32, #tpu.memory_space<vmem>>, vector<1x8x1024xf32>
    %53 = vector.shape_cast %52 : vector<1x8x1024xf32> to vector<8x1024xf32>
    %54 = vector.shape_cast %51 : vector<8x1024xf32> to vector<1x8x1024xf32>
    tpu.vector_store %arg4[%c0_16, %c0_17, %c0_18], %54 {strides = array<i32>} : memref<1x8x1024xf32, #tpu.memory_space<vmem>>, vector<1x8x1024xf32>,
    return
  }
  func.func @transform_0(%arg0: i32, %arg1: i32) -> (i32, i32) {
    %c1_i32 = arith.constant 1 : i32
    %0 = arith.muli %arg0, %c1_i32 : i32
    %1 = arith.addi %0, %arg1 : i32
    %c0_i32 = arith.constant 0 : i32
    %c0_i32_0 = arith.constant 0 : i32
    return %1, %c0_i32 : i32, i32
  }
  func.func @transform_1(%arg0: i32, %arg1: i32) -> (i32, i32) {
    %c1_i32 = arith.constant 1 : i32
    %0 = arith.muli %arg0, %c1_i32 : i32
    %1 = arith.addi %0, %arg1 : i32
    %c0_i32 = arith.constant 0 : i32
    %c0_i32_0 = arith.constant 0 : i32
    return %1, %c0_i32 : i32, i32
  }
  func.func @transform_2(%arg0: i32, %arg1: i32) -> (i32, i32, i32) {
    %c0_i32 = arith.constant 0 : i32
    %c0_i32_0 = arith.constant 0 : i32
    %c0_i32_1 = arith.constant 0 : i32
    return %arg0, %c0_i32, %c0_i32_0 : i32, i32, i32
  }
}

</mosaic_0001>

<bundles_post_ra>
// kernel: tpu_custom_call.1
= control target key start
LH: loop header
LB: loop body
LE: loop exit
PB: predicated region body
PF: predicated region fallthrough
CT: control target
= control target key end

     0   :  { %7 = vsyncpa [#allocation3], 0  ;;  %s806_s0 = inlined_call_operand.hbm [shape: f32[2,1024], index: 0, kind: input, shape index: {}]   ;;  %s807_s1 = inlined_call_operand.hbm [shape: f32[2,1024], index: 1, kind: input, shape index: {}]   ;;  %s808_s2 = inlined_call_operand.hbm [shape: f32[1,8,1024], index: 2, kind: output, shape index: {}]  }
   0x1   :  { %8 = vsyncpa [#allocation6], 0 }
   0x2   :  { %9 = vsyncpa [#allocation4], 0 }
   0x3   :  { %19 = vsyncadd [#allocation3], 768  ;;  %s25_s11 = sshll.u32 %s806_s0, 4  ;;  %s590_s12 = smov [#allocation2]   ;;  %s26_s11 = int_to_ptr.hbm [resolvable:$true] %s25_s11 }
   0x4   :  { %s27_s13 = sshll.u32 %s590_s12, 4  ;;  %s591_s14 = smov 256   ;;  %s28_s13 = int_to_ptr.vmem [resolvable:$true] %s27_s13 }
   0x5   :  { %s592_s15 = smov 16  }
   0x6   :  { %33 = dma.hbm_to_vmem [thread:$0]  %s26_s11, 256, %s28_s13, [#allocation3], %s591_s14, %s591_s14, %s592_s15  }
   0x7   :  { %43 = vsyncadd [#allocation6], 768  ;;  %s49_s18 = sshll.u32 %s807_s1, 4  ;;  %s593_s19 = smov [#allocation5]   ;;  %s50_s18 = int_to_ptr.hbm [resolvable:$true] %s49_s18 }
   0x8   :  { %s51_s20 = sshll.u32 %s593_s19, 4  ;;  %s52_s20 = int_to_ptr.vmem [resolvable:$true] %s51_s20 }
   0x9   :  { %57 = dma.hbm_to_vmem [thread:$0]  %s50_s18, 256, %s52_s20, [#allocation6], %s591_s14, %s591_s14, %s592_s15  }
   0xa   :  { %584 = dma.done.wait [#allocation3], 1024  }
   0xb   :  { %585 = vsyncadd [#allocation3], 4294966272 }
   0xc   :  { %586 = dma.done.wait [#allocation6], 1024  }
   0xd   :  { %587 = vsyncadd [#allocation6], 4294966272  ;;  %v616_v0 = vld [vmem:[#allocation2] sm:$0xff]  ;;  %v618_v1 = vld [vmem:[#allocation2 + $0x10] sm:$0xff]  ;;  %s594_s0 = smov [#allocation7]   ;;  %s447_s23 = sshll.u32 %s808_s2, 4  ;;  %s448_s23 = int_to_ptr.hbm [resolvable:$true] %s447_s23 }
   0xe   :  { %v104_v2 = vand.u32 2147483647, %v616_v0  ;;  %v621_v3 = vld [vmem:[#allocation2 + $0x20] sm:$0xff]  ;;  %v106_v4 = vand.u32 2147483647, %v618_v1  ;;  %v625_v8 = vld [vmem:[#allocation2 + $0x30] sm:$0xff] }
   0xf   :  { %v108_v7 = vand.u32 2147483647, %v621_v3  ;;  %v627_v12 = vld [vmem:[#allocation5] sm:$0xff]  ;;  %v110_v13 = vand.u32 2147483647, %v625_v8  ;;  %v136_v14 = vmax.f32 %v616_v0, 0.0 }
  0x10   :  { %v112_v5 = vsub.f32 0.0, %v104_v2  ;;  %v114_v6 = vsub.f32 0.0, %v106_v4  ;;  %v144_v15 = vmul.f32 %v627_v12, %v616_v0  ;;  %v633_v16 = vld [vmem:[#allocation5 + $0x10] sm:$0xff]  ;;  %v635_v18 = vld [vmem:[#allocation2 + $0x8] sm:$0xff]  ;;  %v320_v19 = vmul.f32 -0.5, %v627_v12  ;;  %v643_v24 = vld [vmem:[#allocation5 + $0x20] sm:$0xff] }
  0x11   :  { %v116_v11 = vsub.f32 0.0, %v108_v7  ;;  %v138_v20 = vmax.f32 %v618_v1, 0.0  ;;  %v146_v21 = vmul.f32 %v633_v16, %v618_v1  ;;  %v118_v22 = vsub.f32 0.0, %v110_v13  ;;  %v646_v26 = vld [vmem:[#allocation5 + $0x30] sm:$0xff]  ;;  %v652_v31 = vld [vmem:[#allocation2 + $0x18] sm:$0xff]  ;;  %v673_v47 = vld [vmem:[#allocation2 + $0x28] sm:$0xff] }
  0x12   :  { %v120_v9 = vmul.f32 1.442695, %v112_v5  ;;  %v124_v10 = vmul.f32 1.442695, %v114_v6  ;;  %vm240_vm0 = vcmp.ge.f32.partialorder %v616_v0, 0.0  ;;  %v322_v23 = vmul.f32 -0.5, %v633_v16 }
  0x13   :  { %v128_v17 = vmul.f32 1.442695, %v116_v11  ;;  %v140_v25 = vmax.f32 %v621_v3, 0.0  ;;  %v148_v27 = vmul.f32 %v643_v24, %v621_v3  ;;  %v324_v28 = vmul.f32 -0.5, %v643_v24  ;;  %s445_s1 = sshll.u32 %s594_s0, 4  ;;  %s446_s1 = int_to_ptr.vmem [resolvable:$true] %s445_s1 }
  0x14   :  { %464 = vpow2.f32 %v120_v9  ;;  %v132_v29 = vmul.f32 1.442695, %v118_v22  ;;  %v105_v30 = vand.u32 2147483647, %v635_v18  ;;  %v654_v32 = vsub.f32 %v136_v14, %v144_v15 }
  0x15   :  { %466 = vpow2.f32 %v124_v10  ;;  %vm242_vm1 = vcmp.ge.f32.partialorder %v618_v1, 0.0  ;;  %v142_v33 = vmax.f32 %v625_v8, 0.0  ;;  %v150_v34 = vmul.f32 %v646_v26, %v625_v8 }
  0x16   :  { %468 = vpow2.f32 %v128_v17  ;;  %v660_v36 = vadd.f32 0.75, %v320_v19  ;;  %v662_v37 = vsub.f32 %v138_v20, %v146_v21  ;;  %v326_v38 = vmul.f32 -0.5, %v646_v26 }
  0x17   :  { %470 = vpow2.f32 %v132_v29  ;;  %v665_v41 = vadd.f32 0.75, %v322_v23  ;;  %vm244_vm2 = vcmp.ge.f32.partialorder %v621_v3, 0.0  ;;  %v107_v42 = vand.u32 2147483647, %v652_v31 }
  0x18   :  { %v669_v44 = vsub.f32 %v140_v25, %v148_v27  ;;  %v671_v45 = vadd.f32 0.75, %v324_v28  ;;  %v113_v46 = vsub.f32 0.0, %v105_v30  ;;  %v675_v50 = vsub.f32 %v142_v33, %v150_v34 }
  0x19   :  { %vm246_vm3 = vcmp.ge.f32.partialorder %v625_v8, 0.0  ;;  %v678_v53 = vadd.f32 0.75, %v326_v38  ;;  %v115_v55 = vsub.f32 0.0, %v107_v42  ;;  %v109_v56 = vand.u32 2147483647, %v673_v47 }
  0x1a   :  { %v465_v35 = vpop.eup %464  ;;  %v122_v60 = vmul.f32 1.442695, %v113_v46  ;;  %v137_v63 = vmax.f32 %v635_v18, 0.0  ;;  %vm241_vm7 = vcmp.ge.f32.partialorder %v635_v18, 0.0  ;;  %vm243_vm9 = vcmp.ge.f32.partialorder %v652_v31, 0.0 }
  0x1b   :  { %v467_v39 = vpop.eup %466  ;;  %v160_v40 = vadd.f32 1.0, %v465_v35  ;;  %v163_v49 = vmul.f32 -0.5, %v465_v35  ;;  %v166_v54 = vand.u32 2147483647, %v465_v35  ;;  %v248_v2 = vsel %vm240_vm0, 1.0, %v465_v35 }
  0x1c   :  { %v178_v43 = vadd.f32 1.0, %v467_v39  ;;  %v469_v48 = vpop.eup %468  ;;  %v181_v51 = vmul.f32 -0.5, %v467_v39  ;;  %v184_v58 = vand.u32 2147483647, %v467_v39  ;;  %v250_v9 = vsel %vm242_vm1, 1.0, %v467_v39 }
  0x1d   :  { %472 = vlog2.f32 %v160_v40  ;;  %v196_v52 = vadd.f32 1.0, %v469_v48  ;;  %v471_v57 = vpop.eup %470  ;;  %v199_v59 = vmul.f32 -0.5, %v469_v48  ;;  %v164_v61 = vadd.f32 1.0, %v163_v49 }
  0x1e   :  { %474 = vrcp.f32 %v160_v40  ;;  %v214_v62 = vadd.f32 1.0, %v471_v57  ;;  %v182_v4 = vadd.f32 1.0, %v181_v51  ;;  %v217_v5 = vmul.f32 -0.5, %v471_v57 }
  0x1f   :  { %476 = vlog2.f32 %v178_v43  ;;  %vm684_vm4 = vcmp.lt.f32.partialorder %v166_v54, 0.0004427343  ;;  %v202_v10 = vand.u32 2147483647, %v469_v48  ;;  %vm690_vm5 = vcmp.lt.f32.partialorder %v184_v58, 0.0004427343 }
  0x20   :  { %478 = vrcp.f32 %v178_v43  ;;  %v200_v0 = vadd.f32 1.0, %v199_v59  ;;  %v126_v14 = vmul.f32 1.442695, %v115_v55  ;;  %v165_v19 = vmul.f32 %v465_v35, %v164_v61 }
  0x21   :  { %480 = vlog2.f32 %v196_v52  ;;  %v183_v23 = vmul.f32 %v467_v39, %v182_v4  ;;  %v252_v1 = vsel %vm244_vm2, 1.0, %v469_v48  ;;  %v218_v25 = vadd.f32 1.0, %v217_v5 }
  0x22   :  { %482 = vrcp.f32 %v196_v52  ;;  %vm697_vm6 = vcmp.lt.f32.partialorder %v202_v10, 0.0004427343  ;;  %v201_v35 = vmul.f32 %v469_v48, %v200_v0  ;;  %v220_v38 = vand.u32 2147483647, %v471_v57 }
  0x23   :  { %v473_v6 = vpop.eup %472  ;;  %484 = vlog2.f32 %v214_v62  ;;  %v254_v40 = vsel %vm246_vm3, 1.0, %v471_v57  ;;  %v219_v8 = vmul.f32 %v471_v57, %v218_v25  ;;  %v738_v25 = vld [vmem:[#allocation2 + $0x38] sm:$0xff]  ;;  %vm245_vm12 = vcmp.ge.f32.partialorder %v673_v47, 0.0 }
  0x24   :  { %v475_v11 = vpop.eup %474  ;;  %486 = vrcp.f32 %v214_v62  ;;  %v162_v17 = vmul.f32 0.6931472, %v473_v6  ;;  %vm714_vm8 = vcmp.lt.f32.partialorder %v220_v38, 0.0004427343  ;;  %vm247_vm14 = vcmp.ge.f32.partialorder %v738_v25, 0.0 }
  0x25   :  { %v477_v15 = vpop.eup %476  ;;  %v272_v20 = vmul.f32 %v475_v11, %v248_v2  ;;  %488 = vpow2.f32 %v122_v60 }
  0x26   :  { %v479_v21 = vpop.eup %478  ;;  %v180_v22 = vmul.f32 0.6931472, %v477_v15  ;;  %490 = vpow2.f32 %v126_v14  ;;  %v168_v39 = vsel %vm684_vm4, %v165_v19, %v162_v17  ;;  %v97_v15 = vld [vmem:[#allocation5 + $0x8] sm:$0xff] }
  0x27   :  { %v481_v27 = vpop.eup %480  ;;  %v280_v28 = vadd.f32 %v272_v20, %v627_v12  ;;  %v288_v29 = vmul.f32 2.0, %v272_v20  ;;  %v274_v30 = vmul.f32 %v479_v21, %v250_v9  ;;  %v232_v57 = vadd.f32 %v168_v39, %v654_v32 }
  0x28   :  { %v483_v34 = vpop.eup %482  ;;  %v186_v48 = vsel %vm690_vm5, %v183_v23, %v180_v22  ;;  %v198_v51 = vmul.f32 0.6931472, %v481_v27  ;;  %v145_v20 = vmul.f32 %v97_v15, %v635_v18 }
  0x29   :  { %v485_v3 = vpop.eup %484  ;;  %v296_v42 = vmul.f32 %v288_v29, %v627_v12  ;;  %v282_v43 = vadd.f32 %v274_v30, %v633_v16  ;;  %v290_v46 = vmul.f32 2.0, %v274_v30  ;;  %v276_v52 = vmul.f32 %v483_v34, %v252_v1 }
  0x2a   :  { %v487_v49 = vpop.eup %486  ;;  %v216_v59 = vmul.f32 0.6931472, %v485_v3  ;;  %v234_v5 = vadd.f32 %v186_v48, %v662_v37  ;;  %v204_v7 = vsel %vm697_vm6, %v201_v35, %v198_v51  ;;  %v153_v33 = vsub.f32 %v137_v63, %v145_v20 }
  0x2b   :  { %v710_v54 = vpop.eup %488  ;;  %v304_v55 = vsub.f32 %v280_v28, %v296_v42  ;;  %v298_v58 = vmul.f32 %v290_v46, %v633_v16  ;;  %v278_v60 = vmul.f32 %v487_v49, %v254_v40  ;;  %v284_v61 = vadd.f32 %v276_v52, %v643_v24 }
  0x2c   :  { %v292_v12 = vmul.f32 2.0, %v276_v52  ;;  %v169_v2 = vadd.f32 1.0, %v710_v54  ;;  %v722_v16 = vpop.eup %490  ;;  %v222_v32 = vsel %vm714_vm8, %v219_v8, %v216_v59  ;;  %v172_v17 = vmul.f32 -0.5, %v710_v54  ;;  %v99_v8 = vld [vmem:[#allocation5 + $0x18] sm:$0xff] }
  0x2d   :  { %v312_v4 = vmul.f32 %v304_v55, %v304_v55  ;;  %v306_v6 = vsub.f32 %v282_v43, %v298_v58  ;;  %v286_v10 = vadd.f32 %v278_v60, %v646_v26  ;;  %v294_v11 = vmul.f32 2.0, %v278_v60 }
  0x2e   :  { %v300_v9 = vmul.f32 %v292_v12, %v643_v24  ;;  %492 = vlog2.f32 %v169_v2  ;;  %v187_v21 = vadd.f32 1.0, %v722_v16  ;;  %v190_v1 = vmul.f32 -0.5, %v722_v16 }
  0x2f   :  { %v336_v13 = vmul.f32 %v660_v36, %v312_v4  ;;  %v314_v0 = vmul.f32 %v306_v6, %v306_v6  ;;  %v302_v37 = vmul.f32 %v294_v11, %v646_v26  ;;  %494 = vrcp.f32 %v169_v2 }
  0x30   :  { %v308_v14 = vsub.f32 %v284_v61, %v300_v9  ;;  %v236_v36 = vadd.f32 %v204_v7, %v669_v44  ;;  %v238_v27 = vadd.f32 %v222_v32, %v675_v50  ;;  %496 = vlog2.f32 %v187_v21 }
  0x31   :  { %v344_v19 = vmul.f32 %v336_v13, %v232_v57  ;;  %v338_v24 = vmul.f32 %v665_v41, %v314_v0  ;;  %v310_v23 = vsub.f32 %v286_v10, %v302_v37  ;;  %v249_v41 = vsel %vm241_vm7, 1.0, %v710_v54 }
  0x32   :  { %v316_v22 = vmul.f32 %v308_v14, %v308_v14  ;;  %v173_v30 = vadd.f32 1.0, %v172_v17  ;;  %498 = vrcp.f32 %v187_v21  ;;  %v175_v34 = vand.u32 2147483647, %v710_v54 }
  0x33   :  { %369 = vst [vmem:[#allocation1] ss:$4 sm:$0xff] %v344_v19  ;;  %v346_v26 = vmul.f32 %v338_v24, %v234_v5  ;;  %v318_v29 = vmul.f32 %v310_v23, %v310_v23  ;;  %v111_v35 = vand.u32 2147483647, %v738_v25  ;;  %v191_v3 = vadd.f32 1.0, %v190_v1 }
  0x34   :  { %v340_v28 = vmul.f32 %v671_v45, %v316_v22  ;;  %v493_v44 = vpop.eup %492  ;;  %v117_v45 = vsub.f32 0.0, %v109_v56  ;;  %v321_v42 = vmul.f32 -0.5, %v97_v15  ;;  %v193_v43 = vand.u32 2147483647, %v722_v16 }
  0x35   :  { %371 = vst [vmem:[#allocation1 + $0x1] ss:$4 sm:$0xff] %v346_v26  ;;  %v495_v50 = vpop.eup %494  ;;  %v342_v40 = vmul.f32 %v678_v53, %v318_v29  ;;  %v251_v18 = vsel %vm243_vm9, 1.0, %v722_v16  ;;  %v171_v46 = vmul.f32 0.6931472, %v493_v44  ;;  %v174_v49 = vmul.f32 %v710_v54, %v173_v30 }
  0x36   :  { %v348_v38 = vmul.f32 %v340_v28, %v236_v36  ;;  %v273_v39 = vmul.f32 %v495_v50, %v249_v41  ;;  %v130_v48 = vmul.f32 1.442695, %v117_v45  ;;  %v497_v51 = vpop.eup %496  ;;  %vm757_vm10 = vcmp.lt.f32.partialorder %v175_v34, 0.0004427343  ;;  %v101_v45 = vld [vmem:[#allocation5 + $0x28] sm:$0xff] }
  0x37   :  { %v350_v63 = vmul.f32 %v342_v40, %v238_v27  ;;  %v119_v55 = vsub.f32 0.0, %v111_v35  ;;  %v139_v59 = vmax.f32 %v652_v31, 0.0  ;;  %v147_v60 = vmul.f32 %v99_v8, %v652_v31 }
  0x38   :  { %373 = vst [vmem:[#allocation1 + $0x2] ss:$4 sm:$0xff] %v348_v38  ;;  %v281_v56 = vadd.f32 %v273_v39, %v97_v15  ;;  %v289_v52 = vmul.f32 2.0, %v273_v39  ;;  %v499_v58 = vpop.eup %498  ;;  %v192_v61 = vmul.f32 %v722_v16, %v191_v3  ;;  %500 = vpow2.f32 %v130_v48 }
  0x39   :  { %375 = vst [vmem:[#allocation1 + $0x3] ss:$4 sm:$0xff] %v350_v63  ;;  %v189_v12 = vmul.f32 0.6931472, %v497_v51  ;;  %v275_v62 = vmul.f32 %v499_v58, %v251_v18  ;;  %v134_v2 = vmul.f32 1.442695, %v119_v55  ;;  %v177_v57 = vsel %vm757_vm10, %v174_v49, %v171_v46 }
  0x3a   :  { %v297_v54 = vmul.f32 %v289_v52, %v97_v15  ;;  %v329_v4 = vadd.f32 0.75, %v321_v42  ;;  %vm766_vm11 = vcmp.lt.f32.partialorder %v193_v43, 0.0004427343  ;;  %v323_v10 = vmul.f32 -0.5, %v99_v8  ;;  %v103_v58 = vld [vmem:[#allocation5 + $0x38] sm:$0xff] }
  0x3b   :  { %v283_v7 = vadd.f32 %v275_v62, %v99_v8  ;;  %v291_v9 = vmul.f32 2.0, %v275_v62  ;;  %v155_v31 = vsub.f32 %v139_v59, %v147_v60  ;;  %502 = vpow2.f32 %v134_v2 }
  0x3c   :  { %v305_v6 = vsub.f32 %v281_v56, %v297_v54  ;;  %v354_v16 = vlaneseq  ;;  %v233_v11 = vadd.f32 %v177_v57, %v153_v33  ;;  %v195_v0 = vsel %vm766_vm11, %v192_v61, %v189_v12 }
  0x3d   :  { %v299_v32 = vmul.f32 %v291_v9, %v99_v8  ;;  %v331_v19 = vadd.f32 0.75, %v323_v10  ;;  %v235_v21 = vadd.f32 %v195_v0, %v155_v31  ;;  %v141_v43 = vmax.f32 %v673_v47, 0.0 }
  0x3e   :  { %v313_v13 = vmul.f32 %v305_v6, %v305_v6  ;;  %v501_v14 = vpop.eup %500  ;;  %v772_v37 = vshrl.u32 %v354_v16, 7  ;;  %v149_v18 = vmul.f32 %v101_v45, %v673_v47  ;;  %v325_v46 = vmul.f32 -0.5, %v101_v45 }
  0x3f   :  { %v307_v17 = vsub.f32 %v283_v7, %v299_v32  ;;  %v205_v24 = vadd.f32 1.0, %v501_v14  ;;  %v208_v23 = vmul.f32 -0.5, %v501_v14  ;;  %v253_v30 = vsel %vm245_vm12, 1.0, %v501_v14 }
  0x40   :  { %v337_v15 = vmul.f32 %v329_v4, %v313_v13  ;;  %v384_v20 = vld.sshfl [vmem:[#allocation1] sm:$0xff pattern:$0x73625140]  ;;  %vm358_vm13 = vcmp.lt.s32.totalorder %v772_v37, 2  ;;  %v211_v39 = vand.u32 2147483647, %v501_v14  ;;  %v157_v47 = vsub.f32 %v141_v43, %v149_v18 }
  0x41   :  { %v315_v22 = vmul.f32 %v307_v17, %v307_v17  ;;  %504 = vlog2.f32 %v205_v24  ;;  %v385_v1 = vld.sshfl [vmem:[#allocation1 + $0x8] sm:$0xff pattern:$0x73625140]  ;;  %v503_v26 = vpop.eup %502  ;;  %v400_v27 = vsel %vm358_vm13, %v384_v20, 0.0  ;;  %v209_v34 = vadd.f32 1.0, %v208_v23 }
  0x42   :  { %v345_v36 = vmul.f32 %v337_v15, %v233_v11  ;;  %506 = vrcp.f32 %v205_v24  ;;  %v401_v41 = vsel %vm358_vm13, %v385_v1, 0.0  ;;  %v223_v29 = vadd.f32 1.0, %v503_v26  ;;  %v386_v44 = vld.sshfl [vmem:[#allocation1 + $0x10] sm:$0xff pattern:$0x73625140]  ;;  %432 = vst [vmem:[#allocation7] sm:$0xff] %v400_v27 }
  0x43   :  { %v339_v28 = vmul.f32 %v331_v19, %v315_v22  ;;  %v402_v35 = vsel %vm358_vm13, %v386_v44, 0.0  ;;  %v387_v50 = vld.sshfl [vmem:[#allocation1 + $0x18] sm:$0xff pattern:$0x73625140]  ;;  %v226_v38 = vmul.f32 -0.5, %v503_v26  ;;  %433 = vst [vmem:[#allocation7 + $0x8] sm:$0xff] %v401_v41  ;;  %v210_v48 = vmul.f32 %v501_v14, %v209_v34 }
  0x44   :  { %377 = vst [vmem:[#allocation1 + $0x20] ss:$4 sm:$0xff] %v345_v36  ;;  %508 = vlog2.f32 %v223_v29  ;;  %v403_v40 = vsel %vm358_vm13, %v387_v50, 0.0  ;;  %v255_v53 = vsel %vm247_vm14, 1.0, %v503_v26  ;;  %vm787_vm15 = vcmp.lt.f32.partialorder %v211_v39, 0.0004427343 }
  0x45   :  { %v347_v33 = vmul.f32 %v339_v28, %v235_v21  ;;  %510 = vrcp.f32 %v223_v29  ;;  %434 = vst [vmem:[#allocation7 + $0x10] sm:$0xff] %v402_v35  ;;  %v227_v51 = vadd.f32 1.0, %v226_v38  ;;  %v229_v59 = vand.u32 2147483647, %v503_v26 }
  0x46   :  { %435 = vst [vmem:[#allocation7 + $0x18] sm:$0xff] %v403_v40  ;;  %v151_v61 = vmul.f32 %v103_v58, %v738_v25  ;;  %v333_v12 = vadd.f32 0.75, %v325_v46  ;;  %v143_v62 = vmax.f32 %v738_v25, 0.0  ;;  %v327_v6 = vmul.f32 -0.5, %v103_v58 }
  0x47   :  { %v505_v3 = vpop.eup %504  ;;  %379 = vst [vmem:[#allocation1 + $0x21] ss:$4 sm:$0xff] %v347_v33  ;;  %v228_v5 = vmul.f32 %v503_v26, %v227_v51  ;;  %vm230_vm0 = vcmp.lt.f32.partialorder %v229_v59, 0.0004427343 }
  0x48   :  { %v507_v42 = vpop.eup %506  ;;  %v207_v49 = vmul.f32 0.6931472, %v505_v3  ;;  %v159_v11 = vsub.f32 %v143_v62, %v151_v61  ;;  %v335_v15 = vadd.f32 0.75, %v327_v6 }
  0x49   :  { %v277_v63 = vmul.f32 %v507_v42, %v253_v30 }
  0x4a   :  { %v509_v56 = vpop.eup %508  ;;  %v213_v57 = vsel %vm787_vm15, %v210_v48, %v207_v49 }
  0x4b   :  { %v285_v8 = vadd.f32 %v277_v63, %v101_v45  ;;  %v293_v55 = vmul.f32 2.0, %v277_v63  ;;  %v511_v60 = vpop.eup %510  ;;  %v225_v4 = vmul.f32 0.6931472, %v509_v56  ;;  %v237_v31 = vadd.f32 %v213_v57, %v157_v47 }
  0x4c   :  { %v279_v2 = vmul.f32 %v511_v60, %v255_v53 }
  0x4d   :  { %v301_v54 = vmul.f32 %v293_v55, %v101_v45  ;;  %v231_v0 = vsel %vm230_vm0, %v228_v5, %v225_v4 }
  0x4e   :  { %v287_v9 = vadd.f32 %v279_v2, %v103_v58  ;;  %v295_v10 = vmul.f32 2.0, %v279_v2  ;;  %v239_v17 = vadd.f32 %v231_v0, %v159_v11 }
  0x4f   :  { %v309_v7 = vsub.f32 %v285_v8, %v301_v54 }
  0x50   :  { %v303_v13 = vmul.f32 %v295_v10, %v103_v58 }
  0x51   :  { %v317_v16 = vmul.f32 %v309_v7, %v309_v7 }
  0x52   :  { %v311_v14 = vsub.f32 %v287_v9, %v303_v13 }
  0x53   :  { %v341_v32 = vmul.f32 %v333_v12, %v317_v16 }
  0x54   :  { %v319_v19 = vmul.f32 %v311_v14, %v311_v14 }
  0x55   :  { %v349_v25 = vmul.f32 %v341_v32, %v237_v31 }
  0x56   :  { %v343_v24 = vmul.f32 %v335_v15, %v319_v19 }
  0x57   :  { %381 = vst [vmem:[#allocation1 + $0x22] ss:$4 sm:$0xff] %v349_v25 }
  0x58   :  { %v351_v20 = vmul.f32 %v343_v24, %v239_v17 }
  0x5a   :  { %383 = vst [vmem:[#allocation1 + $0x23] ss:$4 sm:$0xff] %v351_v20 }
  0x61   :  { %v388_v21 = vld.sshfl [vmem:[#allocation1 + $0x20] sm:$0xff pattern:$0x73625140]  ;;  %v389_v36 = vld.sshfl [vmem:[#allocation1 + $0x28] sm:$0xff pattern:$0x73625140] }
  0x62   :  { %v404_v22 = vsel %vm358_vm13, %v388_v21, 0.0  ;;  %v405_v23 = vsel %vm358_vm13, %v389_v36, 0.0  ;;  %v390_v1 = vld.sshfl [vmem:[#allocation1 + $0x30] sm:$0xff pattern:$0x73625140] }
  0x63   :  { %v406_v26 = vsel %vm358_vm13, %v390_v1, 0.0  ;;  %v391_v27 = vld.sshfl [vmem:[#allocation1 + $0x38] sm:$0xff pattern:$0x73625140]  ;;  %436 = vst [vmem:[#allocation7 + $0x20] sm:$0xff] %v404_v22 }
  0x64   :  { %v407_v41 = vsel %vm358_vm13, %v391_v27, 0.0  ;;  %437 = vst [vmem:[#allocation7 + $0x28] sm:$0xff] %v405_v23 }
  0x65   :  { %438 = vst [vmem:[#allocation7 + $0x30] sm:$0xff] %v406_v26 }
  0x66   :  { %439 = vst [vmem:[#allocation7 + $0x38] sm:$0xff] %v407_v41 }
  0x67   :  { %450 = dma.vmem_to_hbm [thread:$0]  %s446_s1, 1024, %s448_s23, [#allocation4]  }
  0x68   :  { %588 = dma.done.wait [#allocation4], 1024  }
  0x69   :  { %589 = vsyncadd [#allocation4], 4294966272 }
  0x6a   :  { %455 = vsyncpa [#allocation3], 1 }
  0x6b   :  { %456 = vsyncpa [#allocation6], 1 }
  0x6c   :  { %457 = vsyncpa [#allocation4], 1 }

</bundles_post_ra>
